<compile_context>
chip_gen: v7x
topology: tpu7x:2x2x1
jax: 0.10.0
libtpu: 0.0.40
codegen_flags: <defaults>
</compile_context>

<pallas_src>
from dataclasses import dataclass

import jax
import jax.numpy as jnp
from jax.experimental import pallas as pl
from jax.experimental.pallas import tpu as pltpu


def _pad_to(n, m):
    return ((n + m - 1) // m) * m


# ----------------------------------------------------------------------------
# Kernel 1: tiled lm_head matmul  ->  logits  (bf16 x bf16 -> f32, fused bias)
# ----------------------------------------------------------------------------
def _lm_head_kernel_single_k(x_ref, w_ref, b_ref, o_ref):
    # Hp fits in one K step: no accumulator carry, no pl.when branches.
    o_ref[...] = (
        jnp.dot(x_ref[...], w_ref[...], preferred_element_type=jnp.float32)
        + b_ref[...]
    )


def _lm_head_kernel_multi_k(x_ref, w_ref, b_ref, o_ref):
    # Output block is VMEM-resident across k (index_map ignores k): accumulate
    # directly into o_ref; bias folded into the k==0 init.
    @pl.when(pl.program_id(2) == 0)
    def _init():
        o_ref[...] = jnp.broadcast_to(b_ref[...], o_ref.shape)

    o_ref[...] += jnp.dot(
        x_ref[...], w_ref[...], preferred_element_type=jnp.float32
    )


def lm_head_logits(hidden_flat, w, b, *, tm=512, tn=1024):
    """hidden_flat: (N, H), w: (H, V), b: (1, V) -> (N, V) f32 logits.

    Callers should pre-pad H to a multiple of 128 and pre-cast to bf16 once
    (TinyLM does); the pads/casts below are then no-ops under jit.
    """
    N, H = hidden_flat.shape
    V = w.shape[1]

    # Pad only the contraction dim (partial K blocks would pollute the
    # accumulator); multiples of 128 keep bf16 tiles (sublane,lane)-aligned.
    Hp = _pad_to(max(H, 128), 128)
    if Hp <= 1024:
        tk = Hp
    else:
        Hp = _pad_to(H, 512)
        tk = 512
    if Hp != H:
        hidden_flat = jnp.pad(hidden_flat, ((0, 0), (0, Hp - H)))
        w = jnp.pad(w, ((0, Hp - H), (0, 0)))

    tm = min(tm, _pad_to(N, 8))
    tn = min(tn, _pad_to(V, 128))
    nk = Hp // tk

    a = hidden_flat.astype(jnp.bfloat16)        # no-op if pre-cast
    wb = w.astype(jnp.bfloat16)                 # no-op if pre-cast
    bias = b.reshape(1, V).astype(jnp.float32)

    kernel = _lm_head_kernel_single_k if nk == 1 else _lm_head_kernel_multi_k
    grid = (pl.cdiv(N, tm), pl.cdiv(V, tn), nk)

    return pl.pallas_call(
        kernel,
        out_shape=jax.ShapeDtypeStruct((N, V), jnp.float32),
        grid_spec=pltpu.PrefetchScalarGridSpec(
            num_scalar_prefetch=0,
            grid=grid,
            in_specs=[
                pl.BlockSpec((tm, tk), lambda i, j, k: (i, k)),
                pl.BlockSpec((tk, tn), lambda i, j, k: (k, j)),
                # bias block index is constant over k -> only re-DMA'd when j
                # changes (pipeline skips same-index refetches).
                pl.BlockSpec((1, tn), lambda i, j, k: (0, j)),
            ],
            out_specs=pl.BlockSpec((tm, tn), lambda i, j, k: (i, j)),
        ),
        compiler_params=pltpu.CompilerParams(
            dimension_semantics=("parallel", "parallel", "arbitrary"),
            # Planned VMEM ~9-12 MiB at tm=512/tn=1024; raise the scoped limit
            # so v5e's 16 MiB default doesn't force smaller tiles (stays well
            # under v7x's 64 MiB physical VMEM).
            vmem_limit_bytes=48 * 1024 * 1024,
        ),
    )(a, wb, bias)


# ----------------------------------------------------------------------------
# Kernel 2: multiclass_log_probs  ->  per-batch partial sums
#   grid = (B "parallel", token tiles "arbitrary")
#   output (B, 8, 128) f32; [b, 0, 0:4] = [correct, sum(lp*m), sum(p*m), sum(m)]
#   final divides are 3 lines of JAX on the partials.
# ----------------------------------------------------------------------------
def _make_loss_kernel(T, V, mask_rows):
    def kernel(pred_ref, targ_ref, out_ref):
        t = pl.program_id(1)

        pred = pred_ref[...]                      # (1, tt, Vb) f32
        targ = targ_ref[...]                      # (1, tt, 1)  i32
        _, tt, Vb = pred.shape

        vocab_iota = jax.lax.broadcasted_iota(jnp.int32, (1, tt, Vb), 2)

        if Vb != V:
            # Padded vocab columns (only if a producer pads V): exclude from
            # softmax / argmax.
            pred = jnp.where(vocab_iota < V, pred, jnp.float32(-1e30))
        if mask_rows:
            # Token rows past the real array extent may hold OOB garbage; zero
            # them so the softmax stays finite (they are masked by targ==-100).
            row = jax.lax.broadcasted_iota(jnp.int32, (1, tt, 1), 1) + t * tt
            pred = jnp.where(row < T, pred, jnp.float32(0.0))

        mask = targ != -100                       # (1, tt, 1) bool
        targ0 = jnp.where(mask, targ, 0)          # NULL_TOKEN = 0

        # log-softmax statistics without materializing the full lp tensor.
        mx = jnp.max(pred, axis=-1, keepdims=True)            # (1, tt, 1)
        z = pred - mx
        lse = jnp.log(jnp.sum(jnp.exp(z), axis=-1, keepdims=True))
        onehot = vocab_iota == targ0
        tgt_z = jnp.sum(jnp.where(onehot, z, jnp.float32(0.0)),
                        axis=-1, keepdims=True)               # gather(-1, targ)
        ulp = tgt_z - lse                                      # (1, tt, 1)

        # Exact first-index argmax (matches torch.argmax tie-breaking).
        pred_ids = jnp.min(jnp.where(pred == mx, vocab_iota, Vb),
                           axis=-1, keepdims=True)
        correct = (pred_ids == targ0) & mask

        maskf = mask.astype(jnp.float32)
        c = jnp.sum(correct.astype(jnp.float32))
        lp = jnp.sum(ulp * maskf)
        pr = jnp.sum(jnp.exp(ulp) * maskf)
        nm = jnp.sum(maskf)

        # Pack the 4 partials into a lane-dense (1, 8, 128) block.
        sub = jax.lax.broadcasted_iota(jnp.int32, (1, 8, 128), 1)
        lane = jax.lax.broadcasted_iota(jnp.int32, (1, 8, 128), 2)
        on_row0 = sub == 0
        stats = jnp.where(on_row0 & (lane == 0), c,
                 jnp.where(on_row0 & (lane == 1), lp,
                  jnp.where(on_row0 & (lane == 2), pr,
                   jnp.where(on_row0 & (lane == 3), nm, jnp.float32(0.0)))))

        # Output block is resident across t (index_map ignores t): accumulate.
        @pl.when(t == 0)
        def _init():
            out_ref[...] = stats

        @pl.when(t != 0)
        def _acc():
            out_ref[...] = out_ref[...] + stats

    return kernel


def _choose_token_tile(T, V):
    # ~8 MiB per pred buffer (double-buffered -> ~16 MiB total): within the
    # 6-12 MiB recommended range for v5e/v6e/v7x, keeps per-grid-step fixed
    # overhead (~0.35 us) well under 5% even at V ~ 50k.
    budget = 8 * 1024 * 1024
    tt = budget // (V * 4)
    tt = max(8, min(1024, (tt // 8) * 8))
    tt = min(tt, _pad_to(T, 8))
    return tt


def multiclass_log_probs_pallas(pred, targ, shift=False):
    """pred: (B, S, V) float logits, targ: (B, S) int labels."""
    pred = pred.astype(jnp.float32)
    targ = targ.astype(jnp.int32)
    B, S, V = pred.shape

    if shift:
        T = S - 1
        targ_eff = targ[:, 1:]   # tiny int slice; the big logits are untouched
    else:
        T = S
        targ_eff = targ

    tt = _choose_token_tile(T, V)
    nT = pl.cdiv(T, tt)
    Tpad = nT * tt
    if Tpad != T:
        targ_eff = jnp.pad(targ_eff, ((0, 0), (0, Tpad - T)),
                           constant_values=-100)
    targ3 = targ_eff.reshape(B, Tpad, 1)

    mask_rows = Tpad > S       # only then can a pred tile read past the array

    kernel = _make_loss_kernel(T=T, V=V, mask_rows=mask_rows)
    partials = pl.pallas_call(
        kernel,
        out_shape=jax.ShapeDtypeStruct((B, 8, 128), jnp.float32),
        grid_spec=pltpu.PrefetchScalarGridSpec(
            num_scalar_prefetch=0,
            grid=(B, nT),
            in_specs=[
                pl.BlockSpec((1, tt, V), lambda b, t: (b, t, 0)),
                pl.BlockSpec((1, tt, 1), lambda b, t: (b, t, 0)),
            ],
            out_specs=pl.BlockSpec((1, 8, 128), lambda b, t: (b, 0, 0)),
        ),
        compiler_params=pltpu.CompilerParams(
            # Batch axis is parallel (per-batch output blocks) -> both TCs
            # usable on megacore parts; token axis is the reduction.
            dimension_semantics=("parallel", "arbitrary"),
            vmem_limit_bytes=48 * 1024 * 1024,
        ),
    )(pred, targ3)

    totals = jnp.sum(partials[:, 0, :4], axis=0)     # (4,)
    n_tok = totals[3]
    # NOTE: denominator guarded with max(n_tok, 1); the torch reference would
    # produce NaN when every token is masked. Intentional divergence.
    denom = jnp.maximum(n_tok, jnp.float32(1.0))
    log_prob = totals[1] / denom
    return {
        "acc": totals[0] / denom,
        "log_prob": log_prob,
        "prob": totals[2] / denom,
        "n_tokens": n_tok,
        "nll": -log_prob,
    }


def masked_log_probs_pallas(config, pred, targ, shift=False):
    pred = pred.astype(jnp.float32)
    if pred.ndim not in (2, 3):
        raise RuntimeError(f"Expected pred to have 2 or 3 dimensions, got {pred.shape}")
    if pred.shape[-1] == 1:
        # TODO(synk): binary_log_probs path unused for vocab-sized logits.
        raise NotImplementedError
    if pred.ndim == 2:
        pred = pred[None]
        targ = targ[None]
        shift = False
    # TODO(synk): t5 end-token masking (targ != 1) branch not implemented.
    return multiclass_log_probs_pallas(pred, targ, shift=shift)


# ----------------------------------------------------------------------------
# EditableModel equivalent
# ----------------------------------------------------------------------------
@dataclass
class Config:
    model_class: str = "GPT2LMHeadModel"
    model_name: str = "gpt2"


class TinyLM:
    """Synthetic wrapped `self.model`: embedding lookup + lm_head projection.

    Weights are pre-padded (contraction dim -> multiple of 128) and pre-cast
    to bf16 ONCE here, so no per-call HBM re-cast/re-pad of the (H,V) weight.
    """

    def __init__(self, emb, w, b):
        V, H = emb.shape
        Hp = _pad_to(max(H, 128), 128)
        if Hp > 1024:
            Hp = _pad_to(H, 512)
        self.emb = jnp.pad(emb, ((0, 0), (0, Hp - H))).astype(jnp.bfloat16)  # (V, Hp)
        self.w = jnp.pad(w, ((0, Hp - H), (0, 0))).astype(jnp.bfloat16)      # (Hp, V)
        self.b = b.reshape(1, -1).astype(jnp.float32)                        # (1, V)

    def __call__(self, input_ids):
        B, S = input_ids.shape
        hidden = jnp.take(self.emb, input_ids, axis=0)         # glue: (B, S, Hp) bf16
        logits = lm_head_logits(hidden.reshape(B * S, -1), self.w, self.b)
        return logits.reshape(B, S, -1)                         # (B, S, V) f32


class EditableModelPallas:
    def __init__(self, model, config):
        self.model = model
        self.config = config

        def _edit_loss_fn(config, pred, targ):
            mc = config.model_class.lower()
            mn = config.model_name.lower()
            shift = any(k in mc for k in ("gpt", "llama")) or any(
                k in mn for k in ("minigpt4", "blip", "internlm", "chatglm", "qwen")
            )
            if "t5" in mc:
                shift = False
            return masked_log_probs_pallas(config, pred, targ, shift=shift)

        self.edit_loss_fn = _edit_loss_fn
        self.loc_loss_fn = masked_log_probs_pallas

    def forward(self, *inputs, **kwargs):
        return self.model(*inputs, **kwargs)   # _logits(): plain array already


# ----------------------------------------------------------------------------
# Pure-JAX references for validation
# ----------------------------------------------------------------------------
def ref_forward_bf16(emb, w, b, input_ids):
    hidden = jnp.take(emb, input_ids, axis=0)
    hb = hidden.astype(jnp.bfloat16).astype(jnp.float32)
    wb = w.astype(jnp.bfloat16).astype(jnp.float32)
    return jnp.einsum("bsh,hv->bsv", hb, wb) + b[0]


def ref_multiclass(pred, targ, shift=True):
    pred = pred.astype(jnp.float32)
    if shift:
        pred = pred[:, :-1]
        targ = targ[:, 1:]
    mask = targ != -100
    targ0 = jnp.where(mask, targ, 0)
    lp = jax.nn.log_softmax(pred, -1)
    ulp = jnp.take_along_axis(lp, targ0[..., None], axis=-1)[..., 0]
    pred_ids = jnp.where(mask, jnp.argmax(pred, -1).astype(jnp.int32), 0)
    correct = (pred_ids == targ0) & mask
    maskf = mask.astype(jnp.float32)
    n_tok = maskf.sum()
    return {
        "acc": correct.sum() / n_tok,
        "log_prob": (ulp * maskf).sum() / n_tok,
        "prob": (jnp.exp(ulp) * maskf).sum() / n_tok,
        "n_tokens": n_tok,
        "nll": -(ulp * maskf).sum() / n_tok,
    }


if __name__ == "__main__":
    B, S, H, V = 2, 8, 32, 128

    key = jax.random.PRNGKey(0)
    k_emb, k_w, k_ids, k_lbl = jax.random.split(key, 4)
    emb = jax.random.normal(k_emb, (V, H), jnp.float32) * 0.05
    w = jax.random.normal(k_w, (H, V), jnp.float32) * 0.05
    b = jnp.zeros((1, V), jnp.float32)

    input_ids = jax.random.randint(k_ids, (B, S), 0, V, dtype=jnp.int32)
    label_ids = jax.random.randint(k_lbl, (B, S), 0, V, dtype=jnp.int32)
    label_ids = label_ids.at[:, :2].set(-100)   # padded prefix (ignored tokens)

    model = EditableModelPallas(TinyLM(emb, w, b), Config())

    # forward: logits from the tiled Pallas lm_head kernel
    logits = model.forward(input_ids)
    logits = jax.block_until_ready(logits)

    # edit_loss_fn: multiclass_log_probs (shift=True for GPT) Pallas kernel
    stats = model.edit_loss_fn(model.config, logits, label_ids)
    stats = jax.tree_util.tree_map(jax.block_until_ready, stats)

    # validate matmul against bf16-operand / f32-accumulate reference
    logits_ref = ref_forward_bf16(emb, w, b, input_ids)
    assert jnp.allclose(logits, logits_ref, atol=2e-3, rtol=2e-3)

    # validate loss statistics against a pure-JAX reference on the same logits
    stats_ref = ref_multiclass(logits, label_ids, shift=True)
    for name in ("acc", "log_prob", "prob", "n_tokens", "nll"):
        assert jnp.allclose(stats[name], stats_ref[name], atol=1e-4, rtol=1e-4), name

    print("KERNEL_OK")
</pallas_src>

<mosaic_0001>
module attributes {stable_mosaic.version = 11 : i64} {
  func.func @_lm_head_kernel_single_k(%arg0: i32, %arg1: i32, %arg2: i32, %arg3: memref<16x128xbf16, #tpu.memory_space<vmem>>, %arg4: memref<128x128xbf16, #tpu.memory_space<vmem>>, %arg5: memref<1x128xf32, #tpu.memory_space<vmem>>, %arg6: memref<16x128xf32, #tpu.memory_space<vmem>>) attributes {dimension_semantics = [#tpu.dimension_semantics<parallel>, #tpu.dimension_semantics<parallel>, #tpu.dimension_semantics<arbitrary>], iteration_bounds = array<i64: 1, 1, 1>, scalar_prefetch = 0 : i64, scratch_operands = 0 : i64, tpu.core_type = #tpu.core_type<tc>, window_params = [{transform_indices = @transform_0, window_bounds = array<i64: 16, 128>}, {transform_indices = @transform_1, window_bounds = array<i64: 128, 128>}, {transform_indices = @transform_2, window_bounds = array<i64: 1, 128>}, {transform_indices = @transform_3, window_bounds = array<i64: 16, 128>}]} {
    %c0 = arith.constant 0 : index
    %c0_0 = arith.constant 0 : index
    %0 = vector.load %arg3[%c0, %c0_0] : memref<16x128xbf16, #tpu.memory_space<vmem>>, vector<16x128xbf16>
    %c0_1 = arith.constant 0 : index
    %c0_2 = arith.constant 0 : index
    %1 = vector.load %arg4[%c0_1, %c0_2] : memref<128x128xbf16, #tpu.memory_space<vmem>>, vector<128x128xbf16>
    %cst = arith.constant dense<0.000000e+00> : vector<16x128xf32>
    %2 = tpu.matmul %0, %1, %cst {dimension_numbers = #tpu.dot_dimension_numbers<[1], [0], [0], [1], [0, 0, 1, 1], [], []>} : vector<16x128xbf16>, vector<128x128xbf16>, vector<16x128xf32> -> vector<16x128xf32>
    %c0_3 = arith.constant 0 : index
    %c0_4 = arith.constant 0 : index
    %3 = vector.load %arg5[%c0_3, %c0_4] : memref<1x128xf32, #tpu.memory_space<vmem>>, vector<1x128xf32>
    %4 = vector.broadcast %3 : vector<1x128xf32> to vector<16x128xf32>
    %5 = arith.addf %2, %4 : vector<16x128xf32>
    %c0_5 = arith.constant 0 : index
    %c0_6 = arith.constant 0 : index
    %6 = vector.load %arg6[%c0_5, %c0_6] : memref<16x128xf32, #tpu.memory_space<vmem>>, vector<16x128xf32>
    tpu.vector_store %arg6[%c0_5, %c0_6], %5 {strides = array<i32>} : memref<16x128xf32, #tpu.memory_space<vmem>>, vector<16x128xf32>,
    return
  }
  func.func @transform_0(%arg0: i32, %arg1: i32, %arg2: i32) -> (i32, i32) {
    %c0_i32 = arith.constant 0 : i32
    return %arg0, %arg2 : i32, i32
  }
  func.func @transform_1(%arg0: i32, %arg1: i32, %arg2: i32) -> (i32, i32) {
    %c0_i32 = arith.constant 0 : i32
    return %arg2, %arg1 : i32, i32
  }
  func.func @transform_2(%arg0: i32, %arg1: i32, %arg2: i32) -> (i32, i32) {
    %c0_i32 = arith.constant 0 : i32
    %c0_i32_0 = arith.constant 0 : i32
    return %c0_i32, %arg1 : i32, i32
  }
  func.func @transform_3(%arg0: i32, %arg1: i32, %arg2: i32) -> (i32, i32) {
    %c0_i32 = arith.constant 0 : i32
    return %arg0, %arg1 : i32, i32
  }
}

</mosaic_0001>

<bundles_post_ra>
// kernel: tpu_custom_call.1
= control target key start
LH: loop header
LB: loop body
LE: loop exit
PB: predicated region body
PF: predicated region fallthrough
CT: control target
= control target key end

     0   :  { %8 = vsyncpa [#allocation3], 0  ;;  %s381_s0 = inlined_call_operand.hbm [shape: bf16[16,128], index: 0, kind: input, shape index: {}]   ;;  %s382_s1 = inlined_call_operand.hbm [shape: bf16[128,128], index: 1, kind: input, shape index: {}]   ;;  %s383_s2 = inlined_call_operand.vmem [shape: f32[1,128], index: 2, kind: input, shape index: {}]   ;;  %s384_s3 = inlined_call_operand.hbm [shape: f32[16,128], index: 3, kind: output, shape index: {}]  }
   0x1   :  { %9 = vsyncpa [#allocation6], 0 }
   0x2   :  { %10 = vsyncpa [#allocation4], 0  ;;  %s313_s12 = smov [#allocation2]   ;;  %s241_s16 = scalar_lea.hbm %s381_s0, 128 }
   0x3   :  { %s16_s13 = sshll.u32 %s313_s12, 4  ;;  %p242_p0 = scmp.ne.s32.totalorder %s381_s0, %s241_s16  ;;  %s17_s13 = int_to_ptr.vmem [resolvable:$true] %s16_s13 }
   0x4   :  { %p245_p1 = scmp.lt.u32.totalorder %s241_s16, %s381_s0 }
   0x6   :  { %p247_p2 = pnand %p245_p1, %p242_p0 }
   0x8   :  { %250 = shalt.err (!%p247_p2)
}
   0x9   :  { %s251_s21 = scalar_lea.vmem %s17_s13, 128  ;;  %p256_p4 = scmp.lt.s32.totalorder %s17_s13, %s17_s13 }
   0xa   :  { %p252_p3 = scmp.ne.s32.totalorder %s17_s13, %s251_s21  ;;  %p257_p5 = scmp.lt.s32.totalorder %s251_s21, %s251_s21 }
   0xc   :  { %p258_p6 = por %p257_p5, %p256_p4 }
   0xe   :  { %p259_p7 = pnand %p258_p6, %p252_p3 }
  0x10   :  { %262 = shalt.err (!%p259_p7)
}
  0x11   :  { %s314_s22 = smov 64   ;;  %s315_s23 = smov 4  }
  0x12   :  { %22 = dma.hbm_to_vmem [thread:$0]  %s381_s0, 128, %s17_s13, [#allocation3], %s314_s22, %s314_s22, %s315_s23  }
  0x13   :  { %s316_s26 = smov [#allocation5]   ;;  %s263_s30 = scalar_lea.hbm %s382_s1, 1024 }
  0x14   :  { %s28_s27 = sshll.u32 %s316_s26, 4  ;;  %p264_p8 = scmp.ne.s32.totalorder %s382_s1, %s263_s30  ;;  %s29_s27 = int_to_ptr.vmem [resolvable:$true] %s28_s27 }
  0x15   :  { %p267_p9 = scmp.lt.u32.totalorder %s263_s30, %s382_s1 }
  0x17   :  { %p269_p10 = pnand %p267_p9, %p264_p8 }
  0x19   :  { %272 = shalt.err (!%p269_p10)
}
  0x1a   :  { %s273_s8 = scalar_lea.vmem %s29_s27, 1024  ;;  %p278_p12 = scmp.lt.s32.totalorder %s29_s27, %s29_s27 }
  0x1b   :  { %p274_p11 = scmp.ne.s32.totalorder %s29_s27, %s273_s8  ;;  %p279_p13 = scmp.lt.s32.totalorder %s273_s8, %s273_s8 }
  0x1d   :  { %p280_p0 = por %p279_p13, %p278_p12 }
  0x1f   :  { %p281_p1 = pnand %p280_p0, %p274_p11 }
  0x21   :  { %284 = shalt.err (!%p281_p1)
}
  0x22   :  { %34 = dma.hbm_to_vmem [thread:$0]  %s382_s1, 1024, %s29_s27, [#allocation6], %s314_s22, %s314_s22, %s315_s23  }
  0x23   :  { %307 = dma.done.wait [#allocation3], 128  }
  0x24   :  { %308 = vsyncadd [#allocation3], 4294967168 }
  0x25   :  { %309 = dma.done.wait [#allocation6], 1024  }
  0x26   :  { %310 = vsyncadd [#allocation6], 4294966272  ;;  %v317_v0 = vmov 0.0   ;;  %vm318_vm0 = vmmov 0   ;;  %v232_v1 = vld [vmem:[#allocation5] sm:$0xff]   ;;  %v233_v2 = vld [vmem:[#allocation5 + $0x8] sm:$0xff]  }
  0x27   :  { %203 = vmatprep.subr.bf16.mxu0 %v317_v0  ;;  %219 = vmatprep.mubr.msk.bf16.mxu0 %vm318_vm0, %v317_v0  ;;  %v234_v3 = vld [vmem:[#allocation5 + $0x10] sm:$0xff]   ;;  %v235_v4 = vld [vmem:[#allocation5 + $0x18] sm:$0xff]   ;;  %v236_v5 = vld [vmem:[#allocation5 + $0x20] sm:$0xff]   ;;  %s319_s11 = smov [#allocation7]  }
  0x28   :  { %204 = vmatpush3.bf16.msra.mxu0 %v232_v1  ;;  %v237_v6 = vld [vmem:[#allocation5 + $0x28] sm:$0xff]   ;;  %v238_v7 = vld [vmem:[#allocation5 + $0x30] sm:$0xff]   ;;  %v239_v8 = vld [vmem:[#allocation5 + $0x38] sm:$0xff]   ;;  %s171_s12 = sshll.u32 %s319_s11, 4  ;;  %s172_s12 = int_to_ptr.vmem [resolvable:$true] %s171_s12 }
  0x29   :  { %205 = vmatprep.subr.bf16.mxu0 %v317_v0  ;;  %v240_v9 = vld [vmem:[#allocation2] sm:$0xff]   ;;  %s285_s13 = scalar_lea.vmem %s172_s12, 256  ;;  %p290_p3 = scmp.lt.s32.totalorder %s172_s12, %s172_s12 }
  0x2a   :  { %v184_v10 = vld [vmem:[%s383_s2] ss:$0 sm:$0xff]  ;;  %p286_p2 = scmp.ne.s32.totalorder %s172_s12, %s285_s13  ;;  %p291_p4 = scmp.lt.s32.totalorder %s285_s13, %s285_s13 }
  0x2c   :  { %206 = vmatpush3.bf16.msra.mxu0 %v233_v2  ;;  %p292_p5 = por %p291_p4, %p290_p3 }
  0x2d   :  { %207 = vmatprep.subr.bf16.mxu0 %v317_v0 }
  0x2e   :  { %p293_p6 = pnand %p292_p5, %p286_p2 }
  0x30   :  { %208 = vmatpush3.bf16.msra.mxu0 %v234_v3 }
  0x31   :  { %209 = vmatprep.subr.bf16.mxu0 %v317_v0 }
  0x34   :  { %210 = vmatpush3.bf16.msra.mxu0 %v235_v4 }
  0x35   :  { %211 = vmatprep.subr.bf16.mxu0 %v317_v0 }
  0x38   :  { %212 = vmatpush3.bf16.msra.mxu0 %v236_v5 }
  0x39   :  { %213 = vmatprep.subr.bf16.mxu0 %v317_v0 }
  0x3c   :  { %214 = vmatpush3.bf16.msra.mxu0 %v237_v6 }
  0x3d   :  { %215 = vmatprep.subr.bf16.mxu0 %v317_v0 }
  0x40   :  { %216 = vmatpush3.bf16.msra.mxu0 %v238_v7 }
  0x41   :  { %217 = vmatprep.subr.bf16.mxu0 %v317_v0 }
  0x44   :  { %218 = vmatpush3.bf16.msra.mxu0 %v239_v8 }
  0x47   :  { %220 = vmatmul.mubr.bf16.vlgmr.msra.gmra.mrb[0].mxu0 %v240_v9 }
 0x11a   :  { %v157_v11 = vpop.f32.mrb[0].mxu0 }
 0x11b   :  { %v158_v12 = vadd.f32 %v184_v10, %v157_v11  ;;  %v221_v13 = vpop.f32.mrb[1].mxu0 }
 0x11c   :  { %v160_v14 = vpop.f32.mrb[2].mxu0 }
 0x11d   :  { %164 = vst [vmem:[#allocation7] sm:$0xff] %v158_v12  ;;  %v161_v15 = vadd.f32 %v184_v10, %v160_v14  ;;  %v222_v16 = vpop.f32.mrb[3].mxu0 }
 0x11f   :  { %165 = vst [vmem:[#allocation7 + $0x8] sm:$0xff] %v161_v15 }
 0x120   :  { %296 = shalt.err (!%p293_p6)
}
 0x121   :  { %s297_s15 = scalar_lea.hbm %s384_s3, 256 }
 0x122   :  { %p298_p7 = scmp.ne.s32.totalorder %s384_s3, %s297_s15  ;;  %p301_p8 = scmp.lt.u32.totalorder %s297_s15, %s384_s3 }
 0x124   :  { %p303_p9 = pnand %p301_p8, %p298_p7 }
 0x126   :  { %306 = shalt.err (!%p303_p9)
}
 0x127   :  { %s320_s20 = smov 128   ;;  %s321_s21 = smov 8  }
 0x128   :  { %177 = dma.vmem_to_hbm [thread:$0]  %s172_s12, 256, %s384_s3, [#allocation4], %s320_s20, %s320_s20, %s321_s21  }
 0x129   :  { %311 = dma.done.wait [#allocation4], 256  }
 0x12a   :  { %312 = vsyncadd [#allocation4], 4294967040 }
 0x12b   :  { %181 = vsyncpa [#allocation3], 1 }
 0x12c   :  { %182 = vsyncpa [#allocation6], 1 }
 0x12d   :  { %183 = vsyncpa [#allocation4], 1 }

</bundles_post_ra>
